<compile_context>
chip_gen: v6e
topology: v6e:2x2x1
jax: 0.10.0
libtpu: 0.0.40
codegen_flags: <defaults>
</compile_context>

<pallas_src>
import jax
import jax.numpy as jnp
from jax.experimental import pallas as pl
from jax.experimental.pallas import tpu as pltpu

BN_EPS = 1e-5
LANE = 128


def _round_up(x, m):
    return (x + m - 1) // m * m


def conv_pool_stats_kernel(xc_ref, w_ref, pooled_ref, stats_ref, conv_ref):
    # xc_ref:     (1, rows, K)      im2col activations for 2*tR conv rows, K = 9*Cin
    # w_ref:      (K, Cp)           conv weights, Cout zero-padded to Cp (lane dense)
    # pooled_ref: (1, tR, Wo, Cp)   pooled conv output tile
    # stats_ref:  (1, 1, 2, Cp)     per-tile [sum ; sum_of_squares] over (tR, Wo)
    # conv_ref:   (2*tR, W, Cp)     small VMEM staging buffer (single store)
    _, rows, K = xc_ref.shape
    _, tR, Wo, Cp = pooled_ref.shape
    W = 2 * Wo

    # ---- 3x3 conv: ONE MXU matmul (rows, 9*Cin) @ (9*Cin, Cp), f32 accumulate ----
    x = xc_ref[...].reshape(rows, K)
    conv = jnp.dot(x, w_ref[...], preferred_element_type=jnp.float32)   # (rows, Cp)
    conv_ref[...] = conv.reshape(2 * tR, W, Cp)       # single store (no 9x RMW loop)

    # ---- 2x2 max pool, stride 2 --------------------------------------------------
    a = conv_ref[:, pl.ds(0, Wo, stride=2), :]        # even columns (2*tR, Wo, Cp)
    b = conv_ref[:, pl.ds(1, Wo, stride=2), :]        # odd  columns
    wmax = jnp.maximum(a, b)                          # (2*tR, Wo, Cp)
    hr = wmax.reshape(tR, 2, Wo, Cp)
    pooled = jnp.maximum(hr[:, 0, :, :], hr[:, 1, :, :])   # (tR, Wo, Cp)
    pooled_ref[...] = pooled[None]

    # ---- per-tile BN partial statistics (finalized in the wrapper) ---------------
    pf = pooled.reshape(tR * Wo, Cp)
    s = jnp.sum(pf, axis=0, keepdims=True)            # (1, Cp)
    q = jnp.sum(pf * pf, axis=0, keepdims=True)       # (1, Cp)
    stats_ref[...] = jnp.concatenate([s, q], axis=0)[None, None]


def bn_relu_nchw_kernel(p_ref, scale_ref, shift_ref, out_ref):
    # p_ref:   (1, Ho, Wo, Cp)   pooled conv output (lane-dense channels)
    # scale:   (1, Cp)           gamma / sqrt(var + eps)
    # shift:   (1, Cp)           beta - mean * scale
    # out_ref: (1, Cout, Ho*Wo)  NCHW-native output (channel slice + transpose fused)
    _, Ho, Wo, Cp = p_ref.shape
    Cout = out_ref.shape[1]
    p = p_ref[...].reshape(Ho * Wo, Cp)
    y = jnp.maximum(p * scale_ref[...] + shift_ref[...], 0.0)   # lane-dense elementwise
    yt = jnp.transpose(y, (1, 0))                                # (Cp, Ho*Wo), XLU
    out_ref[...] = yt[:Cout, :][None].astype(out_ref.dtype)      # drop padded channels


def x_forward(x_nchw, w_oihw, gamma, beta, *, mxu_dtype=jnp.float32, row_tile=None):
    """Pallas implementation of module X.forward. x_nchw: (N, Cin, H, W) -> (N, Cout, H/2, W/2)."""
    N, Cin, H, W = x_nchw.shape
    Cout = w_oihw.shape[0]
    assert H % 2 == 0 and W % 2 == 0, "MaxPool2d(2,2) path assumes even H, W"
    Ho, Wo = H // 2, W // 2
    Cp = _round_up(Cout, LANE)                    # lane-dense channel dim
    K = 9 * Cin

    # pooled-row tile: divisor of Ho (grid axis 1)
    if row_tile is None:
        row_tile = min(Ho, 4)
    while Ho % row_tile:
        row_tile -= 1
    tR = row_tile
    R = Ho // tR
    rows = 2 * tR * W                             # conv-output rows per tile (flattened)
    assert rows % 8 == 0

    # ---- wrapper glue: NCHW -> NHWC, im2col (H*W, 9*Cin), weights (9*Cin, Cp) ----
    x_nhwc = jnp.transpose(x_nchw, (0, 2, 3, 1)).astype(jnp.float32)
    xp = jnp.pad(x_nhwc, ((0, 0), (1, 1), (1, 1), (0, 0)))
    cols = [xp[:, ky:ky + H, kx:kx + W, :] for ky in range(3) for kx in range(3)]
    x_cols = jnp.concatenate(cols, axis=-1).reshape(N, H * W, K).astype(mxu_dtype)
    w_mat = jnp.transpose(w_oihw, (2, 3, 1, 0)).reshape(K, Cout)
    w_mat = jnp.pad(w_mat, ((0, 0), (0, Cp - Cout))).astype(mxu_dtype)

    # ---- pass 1: fused conv + pool + per-tile BN partial sums --------------------
    pooled, stats = pl.pallas_call(
        conv_pool_stats_kernel,
        out_shape=(
            jax.ShapeDtypeStruct((N, Ho, Wo, Cp), jnp.float32),
            jax.ShapeDtypeStruct((N, R, 2, Cp), jnp.float32),
        ),
        grid=(N, R),
        in_specs=[
            pl.BlockSpec((1, rows, K), lambda n, r: (n, r, 0)),
            pl.BlockSpec((K, Cp), lambda n, r: (0, 0)),
        ],
        out_specs=(
            pl.BlockSpec((1, tR, Wo, Cp), lambda n, r: (n, r, 0, 0)),
            pl.BlockSpec((1, 1, 2, Cp), lambda n, r: (n, r, 0, 0)),
        ),
        scratch_shapes=[pltpu.VMEM((2 * tR, W, Cp), jnp.float32)],
        compiler_params=pltpu.CompilerParams(
            dimension_semantics=("parallel", "parallel")),
    )(x_cols, w_mat)

    # ---- finalize BN statistics (tiny per-channel math, plain JAX) ---------------
    # TODO(synk): E[x^2]-mean^2 in f32; switch to centered per-tile sums for very
    #             large N*Ho*Wo / large activation magnitudes.
    cnt = jnp.float32(N * Ho * Wo)
    s = jnp.sum(stats[:, :, 0, :], axis=(0, 1))
    q = jnp.sum(stats[:, :, 1, :], axis=(0, 1))
    mean = s / cnt
    var = q / cnt - mean * mean                   # biased variance (training mode)
    inv = jax.lax.rsqrt(var + BN_EPS)
    gamma_p = jnp.pad(gamma.astype(jnp.float32), (0, Cp - Cout))
    beta_p = jnp.pad(beta.astype(jnp.float32), (0, Cp - Cout))
    scale = (gamma_p * inv).reshape(1, Cp)
    shift = (beta_p - mean * gamma_p * inv).reshape(1, Cp)

    # ---- pass 2: normalize + ReLU + channel slice + NHWC->NCHW (all in-kernel) ----
    out_flat = pl.pallas_call(
        bn_relu_nchw_kernel,
        out_shape=jax.ShapeDtypeStruct((N, Cout, Ho * Wo), jnp.float32),
        grid=(N,),
        in_specs=[
            pl.BlockSpec((1, Ho, Wo, Cp), lambda n: (n, 0, 0, 0)),
            pl.BlockSpec((1, Cp), lambda n: (0, 0)),
            pl.BlockSpec((1, Cp), lambda n: (0, 0)),
        ],
        out_specs=pl.BlockSpec((1, Cout, Ho * Wo), lambda n: (n, 0, 0)),
        compiler_params=pltpu.CompilerParams(dimension_semantics=("parallel",)),
    )(pooled, scale, shift)

    return out_flat.reshape(N, Cout, Ho, Wo)      # metadata-only reshape, no transpose


def reference_forward(x_nchw, w_oihw, gamma, beta):
    """Plain-JAX reference matching PyTorch semantics (training-mode BN)."""
    conv = jax.lax.conv_general_dilated(
        x_nchw, w_oihw, window_strides=(1, 1), padding=((1, 1), (1, 1)),
        dimension_numbers=("NCHW", "OIHW", "NCHW"))
    pooled = jax.lax.reduce_window(conv, -jnp.inf, jax.lax.max,
                                   (1, 1, 2, 2), (1, 1, 2, 2), "VALID")
    mean = jnp.mean(pooled, axis=(0, 2, 3), keepdims=True)
    var = jnp.mean((pooled - mean) ** 2, axis=(0, 2, 3), keepdims=True)
    y = (pooled - mean) * jax.lax.rsqrt(var + BN_EPS)
    y = y * gamma.reshape(1, -1, 1, 1) + beta.reshape(1, -1, 1, 1)
    return jnp.maximum(y, 0.0)


if __name__ == "__main__":
    # small shapes consistent with the module
    N, Cin, Cout, H, W = 2, 4, 8, 16, 16

    key = jax.random.PRNGKey(0)
    kx, kw, kg, kb = jax.random.split(key, 4)

    x = jax.random.normal(kx, (N, Cin, H, W), dtype=jnp.float32)
    w = 0.1 * jax.random.normal(kw, (Cout, Cin, 3, 3), dtype=jnp.float32)  # OIHW
    gamma = 1.0 + 0.1 * jax.random.normal(kg, (Cout,), dtype=jnp.float32)
    beta = 0.1 * jax.random.normal(kb, (Cout,), dtype=jnp.float32)

    ref = jax.block_until_ready(reference_forward(x, w, gamma, beta))

    # f32 MXU-operand path (tight check)
    out = jax.block_until_ready(x_forward(x, w, gamma, beta))
    assert out.shape == (N, Cout, H // 2, W // 2), out.shape
    assert jnp.allclose(out, ref, atol=2e-3, rtol=2e-3), float(jnp.max(jnp.abs(out - ref)))

    # bf16 MXU-operand path (recommended on v6e/v7x); f32 accumulate. Loose smoke
    # check only — bf16 operand rounding dominates the residual.
    out_bf16 = jax.block_until_ready(
        x_forward(x, w, gamma, beta, mxu_dtype=jnp.bfloat16))
    assert jnp.allclose(out_bf16, ref, atol=1e-1, rtol=0.0), \
        float(jnp.max(jnp.abs(out_bf16 - ref)))

    print("KERNEL_OK")
</pallas_src>

<mosaic_0001>
module attributes {stable_mosaic.version = 11 : i64} {
  func.func @conv_pool_stats_kernel(%arg0: i32, %arg1: i32, %arg2: memref<1x128x36xf32, #tpu.memory_space<vmem>>, %arg3: memref<36x128xf32, #tpu.memory_space<vmem>>, %arg4: memref<1x4x8x128xf32, #tpu.memory_space<vmem>>, %arg5: memref<1x1x2x128xf32, #tpu.memory_space<vmem>>, %arg6: memref<8x16x128xf32, #tpu.memory_space<vmem>>) attributes {dimension_semantics = [#tpu.dimension_semantics<parallel>, #tpu.dimension_semantics<parallel>], iteration_bounds = array<i64: 2, 2>, scalar_prefetch = 0 : i64, scratch_operands = 1 : i64, tpu.core_type = #tpu.core_type<tc>, window_params = [{transform_indices = @transform_0, window_bounds = array<i64: 1, 128, 36>}, {pipeline_mode = #tpu.pipeline_mode<synchronous>, transform_indices = @transform_1, window_bounds = array<i64: 36, 128>}, {transform_indices = @transform_2, window_bounds = array<i64: 1, 4, 8, 128>}, {transform_indices = @transform_3, window_bounds = array<i64: 1, 1, 2, 128>}]} {
    %c0 = arith.constant 0 : index
    %c0_0 = arith.constant 0 : index
    %c0_1 = arith.constant 0 : index
    %0 = vector.load %arg2[%c0, %c0_0, %c0_1] : memref<1x128x36xf32, #tpu.memory_space<vmem>>, vector<1x128x36xf32>
    %1 = vector.shape_cast %0 : vector<1x128x36xf32> to vector<128x36xf32>
    %c0_2 = arith.constant 0 : index
    %c0_3 = arith.constant 0 : index
    %2 = vector.load %arg3[%c0_2, %c0_3] : memref<36x128xf32, #tpu.memory_space<vmem>>, vector<36x128xf32>
    %cst = arith.constant dense<0.000000e+00> : vector<128x128xf32>
    %3 = tpu.matmul %1, %2, %cst {dimension_numbers = #tpu.dot_dimension_numbers<[1], [0], [0], [1], [0, 0, 1, 1], [], []>} : vector<128x36xf32>, vector<36x128xf32>, vector<128x128xf32> -> vector<128x128xf32>
    %4 = vector.shape_cast %3 : vector<128x128xf32> to vector<8x16x128xf32>
    %c0_4 = arith.constant 0 : index
    %c0_5 = arith.constant 0 : index
    %c0_6 = arith.constant 0 : index
    %5 = vector.load %arg6[%c0_4, %c0_5, %c0_6] : memref<8x16x128xf32, #tpu.memory_space<vmem>>, vector<8x16x128xf32>
    tpu.vector_store %arg6[%c0_4, %c0_5, %c0_6], %4 {strides = array<i32>} : memref<8x16x128xf32, #tpu.memory_space<vmem>>, vector<8x16x128xf32>,
    %c0_7 = arith.constant 0 : index
    %c0_8 = arith.constant 0 : index
    %c0_9 = arith.constant 0 : index
    %6 = tpu.strided_load %arg6[%c0_7, %c0_8, %c0_9] {strides = array<i32: 1, 2, 1>} : memref<8x16x128xf32, #tpu.memory_space<vmem>>, vector<8x8x128xf32>
    %c0_10 = arith.constant 0 : index
    %c1 = arith.constant 1 : index
    %c0_11 = arith.constant 0 : index
    %7 = tpu.strided_load %arg6[%c0_10, %c1, %c0_11] {strides = array<i32: 1, 2, 1>} : memref<8x16x128xf32, #tpu.memory_space<vmem>>, vector<8x8x128xf32>
    %8 = arith.maximumf %6, %7 : vector<8x8x128xf32>
    %9 = vector.shape_cast %8 : vector<8x8x128xf32> to vector<4x2x8x128xf32>
    %10 = vector.extract_strided_slice %9 {offsets = [0, 0, 0, 0], sizes = [4, 1, 8, 128], strides = [1, 1, 1, 1]} : vector<4x2x8x128xf32> to vector<4x1x8x128xf32>
    %11 = vector.shape_cast %10 : vector<4x1x8x128xf32> to vector<4x8x128xf32>
    %12 = vector.extract_strided_slice %9 {offsets = [0, 1, 0, 0], sizes = [4, 1, 8, 128], strides = [1, 1, 1, 1]} : vector<4x2x8x128xf32> to vector<4x1x8x128xf32>
    %13 = vector.shape_cast %12 : vector<4x1x8x128xf32> to vector<4x8x128xf32>
    %14 = arith.maximumf %11, %13 : vector<4x8x128xf32>
    %15 = vector.shape_cast %14 : vector<4x8x128xf32> to vector<1x4x8x128xf32>
    %c0_12 = arith.constant 0 : index
    %c0_13 = arith.constant 0 : index
    %c0_14 = arith.constant 0 : index
    %c0_15 = arith.constant 0 : index
    %16 = vector.load %arg4[%c0_12, %c0_13, %c0_14, %c0_15] : memref<1x4x8x128xf32, #tpu.memory_space<vmem>>, vector<1x4x8x128xf32>
    tpu.vector_store %arg4[%c0_12, %c0_13, %c0_14, %c0_15], %15 {strides = array<i32>} : memref<1x4x8x128xf32, #tpu.memory_space<vmem>>, vector<1x4x8x128xf32>,
    %17 = vector.shape_cast %14 : vector<4x8x128xf32> to vector<32x128xf32>
    %cst_16 = arith.constant dense<0.000000e+00> : vector<128xf32>
    %18 = vector.multi_reduction <add>, %17, %cst_16 [0] : vector<32x128xf32> to vector<128xf32>
    %19 = vector.shape_cast %18 : vector<128xf32> to vector<1x128xf32>
    %20 = arith.mulf %17, %17 : vector<32x128xf32>
    %cst_17 = arith.constant dense<0.000000e+00> : vector<128xf32>
    %21 = vector.multi_reduction <add>, %20, %cst_17 [0] : vector<32x128xf32> to vector<128xf32>
    %22 = vector.shape_cast %21 : vector<128xf32> to vector<1x128xf32>
    %23 = tpu.concatenate %19, %22 in 0 : vector<1x128xf32>, vector<1x128xf32> -> vector<2x128xf32>
    %24 = vector.shape_cast %23 : vector<2x128xf32> to vector<1x1x2x128xf32>
    %c0_18 = arith.constant 0 : index
    %c0_19 = arith.constant 0 : index
    %c0_20 = arith.constant 0 : index
    %c0_21 = arith.constant 0 : index
    %25 = vector.load %arg5[%c0_18, %c0_19, %c0_20, %c0_21] : memref<1x1x2x128xf32, #tpu.memory_space<vmem>>, vector<1x1x2x128xf32>
    tpu.vector_store %arg5[%c0_18, %c0_19, %c0_20, %c0_21], %24 {strides = array<i32>} : memref<1x1x2x128xf32, #tpu.memory_space<vmem>>, vector<1x1x2x128xf32>,
    return
  }
  func.func @transform_0(%arg0: i32, %arg1: i32) -> (i32, i32, i32) {
    %c0_i32 = arith.constant 0 : i32
    %c0_i32_0 = arith.constant 0 : i32
    return %arg0, %arg1, %c0_i32 : i32, i32, i32
  }
  func.func @transform_1(%arg0: i32, %arg1: i32) -> (i32, i32) {
    %c0_i32 = arith.constant 0 : i32
    %c0_i32_0 = arith.constant 0 : i32
    %c0_i32_1 = arith.constant 0 : i32
    return %c0_i32, %c0_i32_0 : i32, i32
  }
  func.func @transform_2(%arg0: i32, %arg1: i32) -> (i32, i32, i32, i32) {
    %c0_i32 = arith.constant 0 : i32
    %c0_i32_0 = arith.constant 0 : i32
    %c0_i32_1 = arith.constant 0 : i32
    return %arg0, %arg1, %c0_i32, %c0_i32_0 : i32, i32, i32, i32
  }
  func.func @transform_3(%arg0: i32, %arg1: i32) -> (i32, i32, i32, i32) {
    %c0_i32 = arith.constant 0 : i32
    %c0_i32_0 = arith.constant 0 : i32
    %c0_i32_1 = arith.constant 0 : i32
    return %arg0, %arg1, %c0_i32, %c0_i32_0 : i32, i32, i32, i32
  }
}

</mosaic_0001>

<bundles_post_ra>
// kernel: tpu_custom_call.1
= control target key start
LH: loop header
LB: loop body
LE: loop exit
PB: predicated region body
PF: predicated region fallthrough
CT: control target
= control target key end

     0   :  { %9 = vsyncpa [#allocation4], 0  ;;  %s1214_s0 = inlined_call_operand.vmem [shape: f32[2,256,36], index: 0, kind: input, shape index: {}]   ;;  %s1215_s1 = inlined_call_operand.vmem [shape: f32[36,128], index: 1, kind: input, shape index: {}]   ;;  %s1216_s2 = inlined_call_operand.hbm [shape: f32[2,8,8,128], index: 2, kind: output, shape index: {0}]   ;;  %s1217_s3 = inlined_call_operand.hbm [shape: f32[2,2,2,128], index: 3, kind: output, shape index: {1}]  }
   0x1   :  { %11 = vsyncpa [#allocation4 + $0x1], 0 }
   0x2   :  { %12 = vsyncpa [#allocation6], 0 }
   0x3   :  { %14 = vsyncpa [#allocation6 + $0x1], 0  ;;  %s999_s12 = smov 0   ;;  %s1001_s13 = smov 0  }
   0x4   :  { %s1003_s14 = smov 0   ;;  %s1005_s15 = smov 0  }
   0x5   :  { %s1007_s16 = smov 0   ;;  %s1009_s17 = smov 0  }
   0x6   :  { %s1011_s18 = smov 0   ;;  %s1013_s19 = smov 0  }
   0x7 LB: > { %s672_s20 = sadd.s32 4294967295, %s973_s19   ;;  %s673_s21 = sadd.s32 4294967294, %s973_s19   ;;  %s973_s19 = sphi %s1013_s19, %s20_s19   ;;  %s969_s18 = sphi %s1011_s18, %s1226_s18   ;;  %s965_s17 = sphi %s1009_s17, %s1225_s17   ;;  %s961_s16 = sphi %s1007_s16, %s1224_s16   ;;  %s957_s15 = sphi %s1005_s15, %s1223_s15   ;;  %s953_s14 = sphi %s1003_s14, %s1222_s14   ;;  %s949_s13 = sphi %s1001_s13, %s1221_s13   ;;  %s945_s12 = sphi %s999_s12, %s1220_s12  }
   0x8   : > { %s29_s22 = sadd.s32 1, %s965_s17  ;;  %s32_s23 = sadd.s32 1, %s969_s18 }
   0x9   : > { %p30_p0 = scmp.ge.s32.totalorder %s29_s22, 2  ;;  %p100_p1 = scmp.ne.s32.totalorder %s953_s14, %s949_s13 }
   0xa   : > { %p101_p2 = scmp.eq.s32.totalorder %s672_s20, 3  ;;  %p106_p5 = scmp.ne.s32.totalorder %s949_s13, %s945_s12 }
   0xb   : > { %s1228_s22 = smov (%p30_p0, %s29_s22), 0  ;;  %s1230_s23 = smov (!%p30_p0, %s32_s23), %s969_s18 }
   0xc   : > { %s86_s24 = ssub.s32 %s965_s17, %s1228_s22  ;;  %p1050_p3 = por %p101_p2, %p100_p1 }
   0xd   : > { %p34_p4 = scmp.ge.s32.totalorder %s1230_s23, 2  ;;  %p107_p6 = scmp.eq.s32.totalorder %s673_s21, 3 }
   0xe   : > { %p676_p7 = scmp.ge.s32.totalorder %s973_s19, 1  ;;  %p169_p9 = scmp.lt.s32.totalorder %s973_s19, 5 }
   0xf   : > { %s1232_s23 = smov (%p34_p4, %s1230_s23), 0  ;;  %p1059_p8 = por %p107_p6, %p106_p5 }
  0x10   : > { %s85_s27 = ssub.s32 %s969_s18, %s1232_s23  ;;  %s90_s28 = sadd.s32 1, %s953_s14 }
  0x11   : > { %s87_s29 = sor.u32 %s86_s24, %s85_s27  ;;  %p170_p10 = pnand %p676_p7, %p169_p9 }
  0x12   : > { %p88_p11 = scmp.eq.s32.totalorder %s87_s29, 0  ;;  %s679_s8 = sshll.u32 (!%p170_p10), %s957_s15, 4 }
  0x13   : > { %173 = sbr.rel (%p170_p10) target bundleno = 300 (0x12c), region = 28  ;;  %p203_p12 = scmp.lt.s32.totalorder (!%p170_p10), %s961_s16, 1 }
  0x14   : > { %s1068_s30 = scalar_select %p88_p11, %s953_s14, %s90_s28  }
  0x15   : > { %p205_p13 = scmp.lt.s32.totalorder (!%p170_p10), %s679_s8, 31  ;;  %s701_s10 = sshll.u32 (!%p170_p10), %s957_s15, 2 }
  0x18   : > { %v233_v0 = vld [vmem:[%s1215_s1 + $0x20] sm:$0xf]  ;;  %vm283_vm0 = vcmask 1043456   ;;  %v232_v1 = vld [vmem:[%s1215_s1 + $0x18] sm:$0xff]  ;;  %v231_v2 = vld [vmem:[%s1215_s1 + $0x10] sm:$0xff]  ;;  %s204_s11 = scalar_select %p203_p12, %s961_s16, 1 }
  0x19   : > { %729 = vmatprep.subr.msk.mxu0 %vm283_vm0, %v233_v0  ;;  %763 = vmatprep.subr.msk.mxu1 %vm283_vm0, %v233_v0  ;;  %v230_v3 = vld [vmem:[%s1215_s1 + $0x8] sm:$0xff]  ;;  %s1234_s8 = smov (!%p205_p13, %s679_s8), 31  ;;  %v229_v4 = vld [vmem:[%s1215_s1] sm:$0xff]  ;;  %vm234_vm1 = vcmask 293888  }
  0x1a   : > { %730 = vmatpush3.msk.msra.mxu0 %vm283_vm0, %v233_v0  ;;  %768 = vmatpush3.msk.msra.mxu1 %vm283_vm0, %v233_v0  ;;  %s680_s24 = sshll.u32 %s204_s11, 5  ;;  %s702_s11 = sshll.u32 %s961_s16, 3 }
  0x1b   : > { %731 = vmatprep.subr.mxu0 %v232_v1  ;;  %764 = vmatprep.subr.mxu1 %v232_v1  ;;  %s208_s29 = sadd.s32 %s680_s24, %s1234_s8  ;;  %s1126_s8 = sand.u32 1, %s949_s13  }
  0x1c   : > { %732 = vmatpush3.msra.mxu0 %v232_v1  ;;  %769 = vmatpush3.msra.mxu1 %v232_v1  ;;  %s681_s4 = sshll.u32 %s208_s29, 3  ;;  %s677_s9 = sshll.u32 %s1126_s8, 5 }
  0x1d   : > { %733 = vmatprep.subr.mxu0 %v231_v2  ;;  %765 = vmatprep.subr.mxu1 %v231_v2  ;;  %s1091_s7 = scalar_lea.vmem %s1214_s0, %s681_s4  ;;  %s194_s20 = scalar_lea.vmem [#allocation3], %s677_s9 }
  0x1e   : > { %734 = vmatpush3.msra.mxu0 %v231_v2  ;;  %770 = vmatpush3.msra.mxu1 %v231_v2  ;;  %v213_v5 = vld [vmem:[%s1091_s7] sm:$0xff]  ;;  %v214_v7 = vld [vmem:[%s1091_s7 + $0x8] sm:$0xff]  ;;  %v215_v9 = vld [vmem:[%s1091_s7 + $0x10] sm:$0xff]  ;;  %s538_s21 = sadd.s32 %s702_s11, %s701_s10  ;;  %s541_s24 = sshll.u32 %s194_s20, 4  ;;  %s1131_s24 = int_to_ptr.vmem [resolvable:$true] %s541_s24 }
  0x1f   : > { %735 = vmatprep.subr.mxu0 %v230_v3  ;;  %766 = vmatprep.subr.mxu1 %v230_v3  ;;  %v221_v6 = vld [vmem:[%s1091_s7 + $0x40] sm:$0xff]  ;;  %v222_v8 = vld [vmem:[%s1091_s7 + $0x48] sm:$0xff]  ;;  %v223_v10 = vld [vmem:[%s1091_s7 + $0x50] sm:$0xff]  ;;  %s703_s27 = sshll.u32 %s538_s21, 7  ;;  %s521_s5 = scalar_lea.sflag [#allocation4], %s1126_s8 }
  0x20   : > { %736 = vmatpush3.msra.mxu0 %v230_v3  ;;  %771 = vmatpush3.msra.mxu1 %v230_v3  ;;  %v216_v11 = vld [vmem:[%s1091_s7 + $0x18] sm:$0xff]  ;;  %v217_v13 = vld [vmem:[%s1091_s7 + $0x20] sm:$0xff]  ;;  %v218_v15 = vld [vmem:[%s1091_s7 + $0x28] sm:$0xff]  ;;  %s1136_s4 = scalar_lea.hbm %s1216_s2, %s703_s27  ;;  %s851_s6 = scalar_lea.vmem %s1131_s24, 512 }
  0x21   : > { %737 = vmatprep.subr.mxu0 %v229_v4  ;;  %767 = vmatprep.subr.mxu1 %v229_v4  ;;  %v224_v12 = vld [vmem:[%s1091_s7 + $0x58] sm:$0xff]  ;;  %v225_v14 = vld [vmem:[%s1091_s7 + $0x60] sm:$0xff]  ;;  %v226_v16 = vld [vmem:[%s1091_s7 + $0x68] sm:$0xff]  ;;  %p852_p0 = scmp.ne.s32.totalorder %s1131_s24, %s851_s6 }
  0x22   : > { %738 = vmatpush3.msra.mxu0 %v229_v4  ;;  %772 = vmatpush3.msra.mxu1 %v229_v4  ;;  %v219_v17 = vld [vmem:[%s1091_s7 + $0x30] sm:$0xff]  ;;  %v220_v19 = vld [vmem:[%s1091_s7 + $0x38] sm:$0xff] }
  0x23   : > { %739 = vmatprep.mubr.msk.f32.mxu0 %vm234_vm1, %v213_v5  ;;  %751 = vmatprep.mubr.msk.f32.mxu1 %vm234_vm1, %v221_v6  ;;  %v227_v18 = vld [vmem:[%s1091_s7 + $0x70] sm:$0xff]  ;;  %v228_v20 = vld [vmem:[%s1091_s7 + $0x78] sm:$0xff]  ;;  %p853_p1 = pnand %p852_p0, %p1050_p3  ;;  %s975_s7 = smov [#allocation3]  }
  0x24   : > { %740 = vmatmul.mubr.msk.f32.vlgmr.msra.gmra.mxu0 %vm234_vm1, %v214_v7  ;;  %752 = vmatmul.mubr.msk.f32.vlgmr.msra.gmra.mxu1 %vm234_vm1, %v222_v8  ;;  %s855_s9 = sshll.u32 %s975_s7, 4  ;;  %s856_s9 = int_to_ptr.vmem [resolvable:$false] %s855_s9 }
  0x25   : > { %742 = vmatprep.mubr.msk.f32.mxu0 %vm234_vm1, %v215_v9  ;;  %754 = vmatprep.mubr.msk.f32.mxu1 %vm234_vm1, %v223_v10  ;;  %p854_p2 = pneg %p853_p1  ;;  %s857_s10 = scalar_lea.vmem %s856_s9, 1024 }
  0x26   : > { %p858_p4 = scmp.lt.s32.totalorder %s1131_s24, %s856_s9  ;;  %p859_p5 = scmp.lt.s32.totalorder %s857_s10, %s851_s6 }
  0x28   : > { %743 = vmatmul.mubr.msk.f32.gmra.mxu0 %vm234_vm1, %v216_v11  ;;  %755 = vmatmul.mubr.msk.f32.gmra.mxu1 %vm234_vm1, %v224_v12  ;;  %p860_p6 = por %p859_p5, %p858_p4 }
  0x29   : > { %745 = vmatprep.mubr.msk.f32.mxu0 %vm234_vm1, %v217_v13  ;;  %757 = vmatprep.mubr.msk.f32.mxu1 %vm234_vm1, %v225_v14 }
  0x2a   : > { %p861_p7 = pnand %p860_p6, %p854_p2 }
  0x2c   : > { %746 = vmatmul.mubr.msk.f32.gmra.mxu0 %vm234_vm1, %v218_v15  ;;  %758 = vmatmul.mubr.msk.f32.gmra.mxu1 %vm234_vm1, %v226_v16 }
  0x2d   : > { %748 = vmatprep.mubr.msk.f32.mxu0 %vm234_vm1, %v219_v17  ;;  %760 = vmatprep.mubr.msk.f32.mxu1 %vm234_vm1, %v227_v18 }
  0x30   : > { %749 = vmatmul.mubr.msk.f32.gmra.mxu0 %vm234_vm1, %v220_v19  ;;  %761 = vmatmul.mubr.msk.f32.gmra.mxu1 %vm234_vm1, %v228_v20 }
  0xe4   : > { %v741_v21 = vpop.f32.mrf.mxu0  ;;  %v753_v22 = vpop.f32.mrf.mxu1 }
  0xe5   : > { %433 = vst [vmem:[#allocation2 + $0x8] sm:$0xff] %v741_v21  ;;  %441 = vst [vmem:[#allocation2 + $0x48] sm:$0xff] %v753_v22 }
  0xe6   : > { %v353_v23 = vpop.f32.mrf.mxu0  ;;  %v393_v24 = vpop.f32.mrf.mxu1 }
  0xe7   : > { %432 = vst [vmem:[#allocation2] sm:$0xff] %v353_v23  ;;  %440 = vst [vmem:[#allocation2 + $0x40] sm:$0xff] %v393_v24 }
  0xe8   : > { %v744_v25 = vpop.f32.mrf.mxu0  ;;  %v756_v26 = vpop.f32.mrf.mxu1 }
  0xe9   : > { %435 = vst [vmem:[#allocation2 + $0x18] sm:$0xff] %v744_v25  ;;  %443 = vst [vmem:[#allocation2 + $0x58] sm:$0xff] %v756_v26 }
  0xea   : > { %v363_v27 = vpop.f32.mrf.mxu0  ;;  %v403_v28 = vpop.f32.mrf.mxu1 }
  0xeb   : > { %434 = vst [vmem:[#allocation2 + $0x10] sm:$0xff] %v363_v27  ;;  %442 = vst [vmem:[#allocation2 + $0x50] sm:$0xff] %v403_v28 }
  0xec   : > { %v747_v29 = vpop.f32.mrf.mxu0  ;;  %v759_v30 = vpop.f32.mrf.mxu1 }
  0xed   : > { %437 = vst [vmem:[#allocation2 + $0x28] sm:$0xff] %v747_v29  ;;  %445 = vst [vmem:[#allocation2 + $0x68] sm:$0xff] %v759_v30 }
  0xee   : > { %v373_v31 = vpop.f32.mrf.mxu0  ;;  %v413_v32 = vpop.f32.mrf.mxu1  ;;  %v448_v35 = vld [vmem:[#allocation2] ss:$2 sm:$0xff]  ;;  %v464_v36 = vld [vmem:[#allocation2 + $0x1] ss:$2 sm:$0xff] }
  0xef   : > { %436 = vst [vmem:[#allocation2 + $0x20] sm:$0xff] %v373_v31  ;;  %444 = vst [vmem:[#allocation2 + $0x60] sm:$0xff] %v413_v32  ;;  %v456_v37 = vld [vmem:[#allocation2 + $0x40] ss:$2 sm:$0xff]  ;;  %v472_v38 = vld [vmem:[#allocation2 + $0x41] ss:$2 sm:$0xff]  ;;  %v479_v45 = vmax.f32 %v448_v35, %v464_v36 }
  0xf0   : > { %v750_v33 = vpop.f32.mrf.mxu0  ;;  %v762_v34 = vpop.f32.mrf.mxu1  ;;  %v483_v47 = vmax.f32 %v456_v37, %v472_v38 }
  0xf1   : > { %439 = vst [vmem:[#allocation2 + $0x38] sm:$0xff] %v750_v33  ;;  %447 = vst [vmem:[#allocation2 + $0x78] sm:$0xff] %v762_v34 }
  0xf2   : > { %v383_v39 = vpop.f32.mrf.mxu0  ;;  %v423_v40 = vpop.f32.mrf.mxu1  ;;  %v450_v41 = vld [vmem:[#allocation2 + $0x10] ss:$2 sm:$0xff]  ;;  %v466_v43 = vld [vmem:[#allocation2 + $0x11] ss:$2 sm:$0xff] }
  0xf3   : > { %v458_v42 = vld [vmem:[#allocation2 + $0x50] ss:$2 sm:$0xff]  ;;  %438 = vst [vmem:[#allocation2 + $0x30] sm:$0xff] %v383_v39  ;;  %446 = vst [vmem:[#allocation2 + $0x70] sm:$0xff] %v423_v40  ;;  %v474_v44 = vld [vmem:[#allocation2 + $0x51] ss:$2 sm:$0xff]  ;;  %v480_v46 = vmax.f32 %v450_v41, %v466_v43 }
  0xf4   : > { %v484_v48 = vmax.f32 %v458_v42, %v474_v44 }
  0xf5   : > { %v487_v49 = vmax.f32 %v479_v45, %v480_v46 }
  0xf6   : > { %v489_v50 = vmax.f32 %v483_v47, %v484_v48  ;;  %v452_v51 = vld [vmem:[#allocation2 + $0x20] ss:$2 sm:$0xff]  ;;  %v468_v52 = vld [vmem:[#allocation2 + $0x21] ss:$2 sm:$0xff] }
  0xf7   : > { %491 = vst [vmem:[%s194_s20] sm:$0xff] %v487_v49  ;;  %v460_v53 = vld [vmem:[#allocation2 + $0x60] ss:$2 sm:$0xff]  ;;  %v476_v54 = vld [vmem:[#allocation2 + $0x61] ss:$2 sm:$0xff]  ;;  %v481_v59 = vmax.f32 %v452_v51, %v468_v52  ;;  %v504_v2 = vmul.f32 %v487_v49, %v487_v49 }
  0xf8   : > { %493 = vst [vmem:[%s194_s20 + $0x10] sm:$0xff] %v489_v50  ;;  %v485_v61 = vmax.f32 %v460_v53, %v476_v54 }
  0xfa   : > { %v454_v55 = vld [vmem:[#allocation2 + $0x30] ss:$2 sm:$0xff]  ;;  %v470_v57 = vld [vmem:[#allocation2 + $0x31] ss:$2 sm:$0xff] }
  0xfb   : > { %v462_v56 = vld [vmem:[#allocation2 + $0x70] ss:$2 sm:$0xff]  ;;  %v478_v58 = vld [vmem:[#allocation2 + $0x71] ss:$2 sm:$0xff]  ;;  %v482_v60 = vmax.f32 %v454_v55, %v470_v57 }
  0xfc   : > { %v486_v62 = vmax.f32 %v462_v56, %v478_v58 }
  0xfd   : > { %v488_v63 = vmax.f32 %v481_v59, %v482_v60 }
  0xfe   : > { %v490_v0 = vmax.f32 %v485_v61, %v486_v62 }
  0xff   : > { %492 = vst [vmem:[%s194_s20 + $0x8] sm:$0xff] %v488_v63  ;;  %v495_v1 = vadd.f32 %v488_v63, %v487_v49  ;;  %v505_v3 = vmul.f32 %v488_v63, %v488_v63 }
 0x100   : > { %494 = vst [vmem:[%s194_s20 + $0x18] sm:$0xff] %v490_v0 }
 0x101   : > { %864 = shalt.err (!%p861_p7)
}
 0x102   : > { %s865_s11 = scalar_lea.hbm %s1136_s4, 512  ;;  %s869_s27 = scalar_lea.hbm %s1216_s2, 2048 }
 0x103   : > { %p866_p9 = scmp.ne.s32.totalorder %s1136_s4, %s865_s11  ;;  %p870_p12 = scmp.lt.s32.totalorder %s1136_s4, %s1216_s2 }
 0x104   : > { %p871_p13 = scmp.lt.s32.totalorder %s869_s27, %s865_s11 }
 0x105   : > { %p867_p10 = pnand %p866_p9, %p1050_p3 }
 0x106   : > { %p872_p0 = por %p871_p13, %p870_p12 }
 0x107   : > { %p868_p11 = pneg %p867_p10 }
 0x109   : > { %p873_p1 = pnand %p872_p0, %p868_p11 }
 0x10b   : > { %876 = shalt.err (!%p873_p1)
}
 0x10c   : > { %s976_s6 = smov 128   ;;  %s977_s7 = smov 8   ;;  %v496_v4 = vadd.f32 %v495_v1, %v489_v50  ;;  %v506_v5 = vmul.f32 %v489_v50, %v489_v50  ;;  %v508_v6 = vadd.f32 %v505_v3, %v504_v2  ;;  %v507_v8 = vmul.f32 %v490_v0, %v490_v0 }
 0x10d   : > { %773 = dma.vmem_to_hbm [thread:$0]  (%p1050_p3), %s1131_s24, 512, %s1136_s4, %s521_s5, %s976_s6, %s976_s6, %s977_s7   ;;  %vm517_vm2 = vcmask 1040384  }
 0x10e   : > { %v497_v7 = vadd.f32 %v496_v4, %v490_v0  ;;  %v509_v9 = vadd.f32 %v508_v6, %v506_v5  ;;  %s678_s9 = sshll.u32 %s1126_s8, 1  ;;  %s704_s10 = sshll.u32 %s961_s16, 1 }
 0x10f   : > { %s555_s11 = sadd.s32 %s957_s15, %s704_s10  ;;  %s201_s4 = scalar_lea.vmem [#allocation5], %s678_s9 }
 0x110   : > { %v498_v10 = vrot.slane %v497_v7, 4  ;;  %v510_v11 = vadd.f32 %v509_v9, %v507_v8  ;;  %s705_s24 = sshll.u32 %s555_s11, 5  ;;  %s559_s5 = sshll.u32 %s201_s4, 4  ;;  %s560_s5 = int_to_ptr.vmem [resolvable:$true] %s559_s5 }
 0x111   : > { %s1167_s27 = scalar_lea.hbm %s1217_s3, %s705_s24  ;;  %s526_s16 = scalar_lea.sflag [#allocation6], %s1126_s8 }
 0x112   : > { %v499_v12 = vadd.f32 %v498_v10, %v497_v7  ;;  %v511_v13 = vrot.slane %v510_v11, 4  ;;  %s877_s15 = scalar_lea.vmem %s560_s5, 32  ;;  %s978_s28 = smov [#allocation5]  }
 0x113   : > { %p878_p2 = scmp.ne.s32.totalorder %s560_s5, %s877_s15  ;;  %s881_s29 = sshll.u32 %s978_s28, 4  ;;  %s882_s29 = int_to_ptr.vmem [resolvable:$false] %s881_s29 }
 0x114   : > { %v500_v14 = vrot.slane %v499_v12, 2  ;;  %v512_v15 = vadd.f32 %v511_v13, %v510_v11  ;;  %s883_s6 = scalar_lea.vmem %s882_s29, 64  ;;  %p884_p6 = scmp.lt.s32.totalorder %s560_s5, %s882_s29 }
 0x115   : > { %p879_p4 = pnand %p878_p2, %p1050_p3  ;;  %p885_p7 = scmp.lt.s32.totalorder %s883_s6, %s877_s15 }
 0x116   : > { %v501_v16 = vadd.f32 %v500_v14, %v499_v12  ;;  %v513_v17 = vrot.slane %v512_v15, 2 }
 0x117   : > { %p880_p5 = pneg %p879_p4  ;;  %p886_p9 = por %p885_p7, %p884_p6 }
 0x118   : > { %v502_v18 = vrot.slane %v501_v16, 1  ;;  %v514_v19 = vadd.f32 %v513_v17, %v512_v15 }
 0x119   : > { %p887_p10 = pnand %p886_p9, %p880_p5 }
 0x11a   : > { %v515_v20 = vrot.slane %v514_v19, 1  ;;  %v503_v21 = vadd.f32 %v502_v18, %v501_v16 }
 0x11c   : > { %v516_v22 = vadd.f32 %v515_v20, %v514_v19 }
 0x11e   : > { %v518_v23 = vsel %vm517_vm2, %v503_v21, %v516_v22 }
 0x11f   : > { %519 = vst [vmem:[%s201_s4] sm:$0x3] %v518_v23 }
 0x120   : > { %890 = shalt.err (!%p887_p10)
}
 0x121   : > { %s891_s7 = scalar_lea.hbm %s1167_s27, 32  ;;  %s895_s10 = scalar_lea.hbm %s1217_s3, 128 }
 0x122   : > { %p892_p11 = scmp.ne.s32.totalorder %s1167_s27, %s891_s7  ;;  %p896_p0 = scmp.lt.s32.totalorder %s1167_s27, %s1217_s3 }
 0x123   : > { %p897_p1 = scmp.lt.s32.totalorder %s895_s10, %s891_s7 }
 0x124   : > { %p893_p12 = pnand %p892_p11, %p1050_p3 }
 0x125   : > { %p898_p2 = por %p897_p1, %p896_p0 }
 0x126   : > { %p894_p13 = pneg %p893_p12 }
 0x128   : > { %p899_p4 = pnand %p898_p2, %p894_p13 }
 0x12a   : > { %902 = shalt.err (!%p899_p4)
}
 0x12b   : > { %774 = dma.vmem_to_hbm [thread:$0]  (%p1050_p3), %s560_s5, 32, %s1167_s27, %s526_s16  }
 0x12c PF: > { %p784_p5 = scmp.ge.s32.totalorder %s973_s19, 2  ;;  %s571_s4 = sand.u32 1, %s945_s12  }
 0x12d   : > { %s572_s20 = scalar_lea.sflag [#allocation4], %s571_s4 }
 0x12e   : > { %p778_p6 = pnand %p784_p5, %p1059_p8 }
 0x130   : > { %p779_p7 = pneg %p778_p6 }
 0x132   : > { %936 = dma.done.wait (%p779_p7), %s572_s20, 512  }
 0x133   : > { %938 = vsyncadd (%p779_p7), %s572_s20, 4294966784  ;;  %s581_s21 = scalar_lea.sflag [#allocation6], %s571_s4 }
 0x134   : > { %940 = dma.done.wait (%p779_p7), %s581_s21, 32  }
 0x135   : > { %942 = vsyncadd (%p779_p7), %s581_s21, 4294967264  ;;  %s20_s19 = sadd.s32 1, %s973_s19   ;;  %s1220_s12 = smov %s949_s13 }
 0x136   : > { %p17_p9 = scmp.ge.s32.totalorder %s20_s19, 6   ;;  %s1221_s13 = smov %s953_s14 }
 0x137   : > { %s1222_s14 = smov %s1068_s30  ;;  %s1223_s15 = smov %s965_s17 }
 0x138   : > { %s1224_s16 = smov %s969_s18  ;;  %s1225_s17 = smov %s1228_s22 }
 0x139   : > { %s1226_s18 = smov %s1232_s23  ;;  %19 = sbr.rel (!%p17_p9) target bundleno = 7 (0x7), region = 95 }
 0x13e   :  { %586 = vsyncpa [#allocation4], 1 }
 0x13f   :  { %588 = vsyncpa [#allocation4 + $0x1], 1 }
 0x140   :  { %589 = vsyncpa [#allocation6], 1 }
 0x141   :  { %591 = vsyncpa [#allocation6 + $0x1], 1 }

</bundles_post_ra>
